<compile_context>
chip_gen: v6e
topology: v6e:2x2x1
jax: 0.10.0
libtpu: 0.0.40
codegen_flags: <defaults>
</compile_context>

<pallas_src>
import jax
import jax.numpy as jnp
from jax.experimental import pallas as pl
from jax.experimental.pallas import tpu as pltpu


def _copy_kernel(x_ref, o_ref):
    # Pure tile copy: no in-kernel slicing, input/output tiles are congruent.
    o_ref[...] = x_ref[...]


def _round_up(x: int, m: int) -> int:
    return ((x + m - 1) // m) * m


def _cdiv(x: int, m: int) -> int:
    return (x + m - 1) // m


def _sublane_multiple(dtype) -> int:
    # Sub-32-bit dtypes pack along sublanes; keep row tiles aligned to the
    # packing factor so stores stay full-vreg (unmasked) stores.
    itemsize = jnp.dtype(dtype).itemsize
    return max(8, 8 * (4 // max(itemsize, 1)))  # f32->8, bf16->16, int8->32


def chomp1d_reference(x: jax.Array, chomp_size: int) -> jax.Array:
    """Production path: the chomp is just a slice (zero-FLOP, fuse upstream)."""
    return x[:, :, : x.shape[-1] - chomp_size]


def chomp1d(x: jax.Array, chomp_size: int, *,
            target_tile_bytes: int = 4 << 20,   # ~4 MiB per buffer
            max_lane_tile: int = 2048) -> jax.Array:
    """Equivalent of PyTorch Chomp1d(chomp_size)(x) for x of shape (N, C, L)."""
    assert x.ndim == 3, "expected (N, C, L)"
    N, C, L = x.shape
    # Intentional: reject the degenerate torch case chomp_size=0 (which yields
    # an empty tensor via `:-0`) and chomp_size >= L (empty/invalid output).
    assert 0 < chomp_size < L, "chomp_size must be in (0, L)"
    out_len = L - chomp_size

    # The chomp only slices the last axis and (N, C, L) is contiguous, so this
    # collapse is a free metadata reshape on both sides of the kernel.
    rows = N * C
    x2 = x.reshape(rows, L)

    itemsize = jnp.dtype(x.dtype).itemsize
    sub = _sublane_multiple(x.dtype)
    rows_pad = _round_up(rows, sub)
    cols_pad = _round_up(out_len, 128)

    # --- lane (column) tile: balanced and lane-dense ------------------------
    n_col = max(1, _cdiv(out_len, max_lane_tile))
    tl = min(_round_up(_cdiv(out_len, n_col), 128), cols_pad)

    # --- row tile: fill the per-buffer byte budget, balanced & aligned ------
    target_rows = max(sub, (target_tile_bytes // max(tl * itemsize, 1)) // sub * sub)
    tr = min(target_rows, rows_pad)
    n_row = max(1, _cdiv(rows, tr))
    tr = min(_round_up(_cdiv(rows, n_row), sub), rows_pad)

    # --- megacore nudge (v7x): make sure >=2 blocks exist for large copies --
    total_bytes = rows_pad * cols_pad * itemsize
    if _cdiv(rows, tr) * _cdiv(out_len, tl) == 1 and total_bytes >= (1 << 20):
        if cols_pad >= 256:
            tl = _round_up(_cdiv(out_len, 2), 128)        # 2 column blocks
        elif rows_pad >= 2 * sub:
            tr = _round_up(_cdiv(rows, 2), sub)           # 2 row blocks

    grid = (_cdiv(rows, tr), _cdiv(out_len, tl))

    # Double-buffered input + output tiles, plus headroom; explicit so v5e's
    # 16 MiB scoped-VMEM default doesn't reject ~4 MiB tiles.  Clamped to
    # 32 MiB, which is safe on v5e/v6e (128 MiB physical) and v7x (64 MiB).
    pipeline_bytes = 2 * 2 * tr * tl * itemsize
    vmem_limit = min(32 << 20, max(16 << 20, pipeline_bytes + (4 << 20)))

    out2 = pl.pallas_call(
        _copy_kernel,
        out_shape=jax.ShapeDtypeStruct((rows, out_len), x.dtype),
        grid=grid,
        # Same tile shape and index_map for input and output: the chomped tail
        # columns [out_len, L) are only pulled in as padding of the final
        # partial column block, and the matching output lanes are masked.
        in_specs=[pl.BlockSpec((tr, tl), lambda i, j: (i, j))],
        out_specs=pl.BlockSpec((tr, tl), lambda i, j: (i, j)),
        compiler_params=pltpu.CompilerParams(
            dimension_semantics=("parallel", "parallel"),
            vmem_limit_bytes=vmem_limit),
        cost_estimate=pl.CostEstimate(
            flops=0, transcendentals=0,
            bytes_accessed=2 * rows * out_len * itemsize),
    )(x2)

    return out2.reshape(N, C, out_len)


if __name__ == "__main__":
    key = jax.random.PRNGKey(0)

    # Small shape consistent with the module's (N, C, L) conv layout.
    chomp_size = 3
    N, C, L = 2, 4, 16
    x = jax.random.normal(key, (N, C, L), dtype=jnp.float32)

    y = jax.block_until_ready(chomp1d(x, chomp_size))
    ref = chomp1d_reference(x, chomp_size)
    assert y.shape == (N, C, L - chomp_size)
    assert y.dtype == x.dtype
    assert jnp.array_equal(y, ref)

    # Second check exercising masked edge tiles (rows not a multiple of the
    # sublane tile, out_len not a multiple of 128, ragged trailing block).
    chomp2 = 5
    N2, C2, L2 = 2, 12, 300
    x2 = jax.random.normal(jax.random.PRNGKey(0), (N2, C2, L2), dtype=jnp.float32)
    y2 = jax.block_until_ready(chomp1d(x2, chomp2))
    assert jnp.array_equal(y2, x2[:, :, : L2 - chomp2])

    # Third check: sub-32-bit dtype (bf16 sublane packing path).
    chomp3 = 7
    N3, C3, L3 = 2, 6, 40
    x3 = jax.random.normal(jax.random.PRNGKey(0), (N3, C3, L3)).astype(jnp.bfloat16)
    y3 = jax.block_until_ready(chomp1d(x3, chomp3))
    assert jnp.array_equal(y3, x3[:, :, : L3 - chomp3])

    print("KERNEL_OK")
</pallas_src>

<mosaic_0001>
module attributes {stable_mosaic.version = 11 : i64} {
  func.func @_copy_kernel(%arg0: i32, %arg1: i32, %arg2: memref<8x128xf32, #tpu.memory_space<vmem>>, %arg3: memref<8x128xf32, #tpu.memory_space<vmem>>) attributes {dimension_semantics = [#tpu.dimension_semantics<parallel>, #tpu.dimension_semantics<parallel>], iteration_bounds = array<i64: 1, 1>, scalar_prefetch = 0 : i64, scratch_operands = 0 : i64, tpu.core_type = #tpu.core_type<tc>, window_params = [{transform_indices = @transform_0, window_bounds = array<i64: 8, 128>}, {transform_indices = @transform_1, window_bounds = array<i64: 8, 128>}]} {
    %c0 = arith.constant 0 : index
    %c0_0 = arith.constant 0 : index
    %0 = vector.load %arg2[%c0, %c0_0] : memref<8x128xf32, #tpu.memory_space<vmem>>, vector<8x128xf32>
    %c0_1 = arith.constant 0 : index
    %c0_2 = arith.constant 0 : index
    %1 = vector.load %arg3[%c0_1, %c0_2] : memref<8x128xf32, #tpu.memory_space<vmem>>, vector<8x128xf32>
    tpu.vector_store %arg3[%c0_1, %c0_2], %0 {strides = array<i32>} : memref<8x128xf32, #tpu.memory_space<vmem>>, vector<8x128xf32>,
    return
  }
  func.func @transform_0(%arg0: i32, %arg1: i32) -> (i32, i32) {
    %c0_i32 = arith.constant 0 : i32
    return %arg0, %arg1 : i32, i32
  }
  func.func @transform_1(%arg0: i32, %arg1: i32) -> (i32, i32) {
    %c0_i32 = arith.constant 0 : i32
    return %arg0, %arg1 : i32, i32
  }
}

</mosaic_0001>

<bundles_post_ra>
// kernel: tpu_custom_call.1
= control target key start
LH: loop header
LB: loop body
LE: loop exit
PB: predicated region body
PF: predicated region fallthrough
CT: control target
= control target key end

     0   :  { %6 = vsyncpa [#allocation3], 0  ;;  %s102_s0 = inlined_call_operand.hbm [shape: f32[8,16], index: 0, kind: input, shape index: {}]   ;;  %s103_s1 = inlined_call_operand.hbm [shape: f32[8,13], index: 1, kind: output, shape index: {}]  }
   0x1   :  { %7 = vsyncpa [#allocation4], 0  ;;  %s84_s6 = smov [#allocation2]  }
   0x2   :  { %s14_s7 = sshll.u32 %s84_s6, 4  ;;  %s15_s7 = int_to_ptr.vmem [resolvable:$true] %s14_s7 }
   0x3   :  { %s48_s8 = scalar_lea.vmem %s15_s7, 128  ;;  %p53_p1 = scmp.lt.s32.totalorder %s15_s7, %s15_s7 }
   0x4   :  { %p49_p0 = scmp.ne.s32.totalorder %s15_s7, %s48_s8  ;;  %p54_p2 = scmp.lt.s32.totalorder %s48_s8, %s48_s8 }
   0x6   :  { %p55_p3 = por %p54_p2, %p53_p1 }
   0x8   :  { %p56_p4 = pnand %p55_p3, %p49_p0 }
   0xa   :  { %59 = shalt.err (!%p56_p4)
}
   0xb   :  { %17 = dma.hbm_to_vmem [thread:$0]  %s102_s0, 128, %s15_s7, [#allocation3]  }
   0xc   :  { %80 = dma.done.wait [#allocation3], 128  }
   0xd   :  { %81 = vsyncadd [#allocation3], 4294967168  ;;  %s85_s11 = smov [#allocation5]   ;;  %v21_v0 = vld [vmem:[#allocation2] sm:$0xff] }
   0xe   :  { %s29_s12 = sshll.u32 %s85_s11, 4  ;;  %22 = vst [vmem:[#allocation5] sm:$0xff] %v21_v0  ;;  %s30_s12 = int_to_ptr.vmem [resolvable:$true] %s29_s12 }
   0xf   :  { %s60_s13 = scalar_lea.vmem %s30_s12, 128  ;;  %p65_p6 = scmp.lt.s32.totalorder %s30_s12, %s30_s12 }
  0x10   :  { %p61_p5 = scmp.ne.s32.totalorder %s30_s12, %s60_s13  ;;  %p66_p7 = scmp.lt.s32.totalorder %s60_s13, %s60_s13 }
  0x12   :  { %p67_p8 = por %p66_p7, %p65_p6 }
  0x14   :  { %p68_p9 = pnand %p67_p8, %p61_p5 }
  0x16   :  { %71 = shalt.err (!%p68_p9)
}
  0x17   :  { %32 = dma.vmem_to_hbm [thread:$0]  %s30_s12, 128, %s103_s1, [#allocation4]  }
  0x18   :  { %82 = dma.done.wait [#allocation4], 128  }
  0x19   :  { %83 = vsyncadd [#allocation4], 4294967168 }
  0x1a   :  { %36 = vsyncpa [#allocation3], 1 }
  0x1b   :  { %37 = vsyncpa [#allocation4], 1 }

</bundles_post_ra>
